<compile_context>
chip_gen: v7x
topology: tpu7x:2x2x1
jax: 0.10.0
libtpu: 0.0.40
codegen_flags: <defaults>
</compile_context>

<pallas_src>
import functools
from typing import NamedTuple

import numpy as np

import jax
import jax.numpy as jnp
from jax.experimental import pallas as pl
from jax.experimental.pallas import tpu as pltpu


def _round_up(a: int, m: int) -> int:
    return (a + m - 1) // m * m


class _Geom(NamedTuple):
    n_nodes: int
    n_pad: int
    e_pad: int
    tile_n: int
    tile_e: int
    kmax: int       # max number of edge blocks touched by any node tile
    num_eb: int     # total number of edge blocks (e_pad // tile_e)
    zpad: int       # 2F + D rounded up to a multiple of 8 (NO 128-lane padding)
    feat: int       # F


# --------------------------------------------------------------------------- #
# Pallas kernel: one CGConv layer (fused gated matmul + segment-mean + BN + res)
# --------------------------------------------------------------------------- #
def _cgconv_kernel(blk_lo_ref, nblk_ref,                         # scalar prefetch (SMEM)
                   z_ref, w_ref, b_ref, st_ref, en_ref,
                   scale_ref, shift_ref, xres_ref,               # VMEM inputs
                   o_ref):                                       # VMEM output (accumulator)
    n = pl.program_id(0)            # node tile
    k = pl.program_id(1)            # edge block within this node tile
    tile_n, feat = o_ref.shape
    tile_e = z_ref.shape[0]

    @pl.when(k == 0)
    def _init():
        o_ref[...] = jnp.zeros_like(o_ref)

    @pl.when(k < nblk_ref[n])
    def _accumulate():
        # Fused gate matmul: bf16 operands on the MXU, f32 accumulation (K = 2F+D).
        pre = jnp.dot(z_ref[...], w_ref[...],
                      preferred_element_type=jnp.float32) + b_ref[...]        # [tile_e, 2F]
        # Gating stays f32 (v5e has no bf16 EUP); message cast to bf16 for the
        # aggregation matmul (within the validation tolerance).
        msg = (jax.nn.sigmoid(pre[:, :feat])
               * jax.nn.softplus(pre[:, feat:])).astype(jnp.bfloat16)          # [tile_e, F]

        # Segment-sum: edges are sorted by dst, so global edge e belongs to local
        # node row r iff start[r] <= e < end[r].  Build a [tile_n, tile_e] 0/1
        # mask directly in bf16 (exact) — no [N, E] matrix anywhere, bf16 MXU matmul.
        e0 = (blk_lo_ref[n] + k) * tile_e
        eg = jax.lax.broadcasted_iota(jnp.int32, (tile_n, tile_e), 1) + e0
        mask = jnp.logical_and(eg >= st_ref[...], eg < en_ref[...]).astype(jnp.bfloat16)
        o_ref[...] += jnp.dot(mask, msg, preferred_element_type=jnp.float32)

    @pl.when(k == pl.num_programs(1) - 1)
    def _finalize():
        deg = (en_ref[...] - st_ref[...]).astype(jnp.float32)                  # [tile_n, 1]
        mean = o_ref[...] * (1.0 / jnp.maximum(deg, 1.0))
        # eval-mode BatchNorm folded into per-channel scale/shift, then residual.
        o_ref[...] = mean * scale_ref[...] + shift_ref[...] + xres_ref[...]


# --------------------------------------------------------------------------- #
# Per-layer wrapper around pallas_call
# --------------------------------------------------------------------------- #
def _cgconv_layer(geom, x_res, z, blk_lo, nblk, node_start, node_end, params,
                  *, eps=1e-5):
    F = geom.feat
    nt = geom.n_pad // geom.tile_n

    # Fuse the two gate projections into one [zpad, 2F] bf16 weight (+ [1, 2F] bias).
    w_fused = jnp.concatenate([params["w_f"], params["w_s"]], axis=1)
    w_fused = jnp.pad(w_fused, ((0, geom.zpad - w_fused.shape[0]), (0, 0)))
    w_fused = w_fused.astype(jnp.bfloat16)
    b_fused = jnp.concatenate([params["b_f"], params["b_s"]])[None, :].astype(jnp.float32)

    # eval-mode BatchNorm1d folded into per-channel scale / shift
    scale = params["bn_gamma"] * jax.lax.rsqrt(params["bn_var"] + eps)
    shift = params["bn_beta"] - params["bn_mean"] * scale
    scale = scale[None, :].astype(jnp.float32)
    shift = shift[None, :].astype(jnp.float32)

    node_map = lambda n, k, blo, nbl: (n, 0)
    const_map = lambda n, k, blo, nbl: (0, 0)

    def z_map(n, k, blo, nbl):
        # pl.when-skipped iterations (k >= nblk[n]) re-present the LAST real block
        # of this node tile, so the pipeline elides the redundant DMA.  Clamp at
        # num_eb-1 covers node tiles with nblk == 0 whose blk_lo may point past
        # the final block.
        last = jnp.minimum(blo[n] + jnp.maximum(nbl[n], 1) - 1, geom.num_eb - 1)
        return (jnp.minimum(blo[n] + k, last), 0)

    cost = pl.CostEstimate(
        flops=int(2 * geom.e_pad * geom.zpad * 2 * F
                  + 2 * nt * geom.kmax * geom.tile_n * geom.tile_e * F),
        transcendentals=int(3 * geom.e_pad * F),
        bytes_accessed=int(z.size * 2 + w_fused.size * 2 + 3 * geom.n_pad * F * 4),
    )

    out = pl.pallas_call(
        _cgconv_kernel,
        out_shape=jax.ShapeDtypeStruct((geom.n_pad, F), jnp.float32),
        grid_spec=pltpu.PrefetchScalarGridSpec(
            num_scalar_prefetch=2,
            grid=(nt, geom.kmax),
            in_specs=[
                pl.BlockSpec((geom.tile_e, geom.zpad), z_map),   # z  (bf16, streamed, unpadded lanes)
                pl.BlockSpec((geom.zpad, 2 * F), const_map),     # W_f|W_s  (resident)
                pl.BlockSpec((1, 2 * F), const_map),             # b_f|b_s  (resident)
                pl.BlockSpec((geom.tile_n, 1), node_map),        # segment starts
                pl.BlockSpec((geom.tile_n, 1), node_map),        # segment ends
                pl.BlockSpec((1, F), const_map),                 # BN scale
                pl.BlockSpec((1, F), const_map),                 # BN shift
                pl.BlockSpec((geom.tile_n, F), node_map),        # residual x
            ],
            out_specs=pl.BlockSpec((geom.tile_n, F), node_map),
        ),
        compiler_params=pltpu.CompilerParams(
            dimension_semantics=("parallel", "arbitrary"),
            # Actual double-buffered footprint is < 2 MiB even at tile_e=2048;
            # 16 MiB leaves ample headroom and stays safe on v7x's 64 MiB VMEM.
            vmem_limit_bytes=16 * 1024 * 1024,
        ),
        cost_estimate=cost,
    )(blk_lo, nblk, z, w_fused, b_fused, node_start, node_end, scale, shift, x_res)
    return out


def _build_z(x_bf16, src_s, dst_s, edge_attr_bf16):
    """Per-edge feature concat (XLA glue). Operands are already sorted, padded and
    bf16, so this is a single gather+concat producing [e_pad, zpad] directly."""
    return jnp.concatenate([x_bf16[dst_s], x_bf16[src_s], edge_attr_bf16], axis=-1)


@functools.partial(jax.jit, static_argnums=(0,))
def _forward_impl(geom, x, edge_attr_s, src_s, dst_s,
                  blk_lo, nblk, node_start, node_end, params1, params2):
    x_pad = jnp.pad(x.astype(jnp.float32),
                    ((0, geom.n_pad - geom.n_nodes), (0, 0)))

    z1 = _build_z(x_pad.astype(jnp.bfloat16), src_s, dst_s, edge_attr_s)
    h = _cgconv_layer(geom, x_pad, z1, blk_lo, nblk, node_start, node_end, params1)
    # dropout1: eval-mode identity
    z2 = _build_z(h.astype(jnp.bfloat16), src_s, dst_s, edge_attr_s)
    h = _cgconv_layer(geom, h, z2, blk_lo, nblk, node_start, node_end, params2)
    # dropout2: eval-mode identity
    return h[: geom.n_nodes]


# --------------------------------------------------------------------------- #
# Host-side (static) edge preprocessing — shared by both conv layers
# --------------------------------------------------------------------------- #
def _edge_geometry(edge_index_np, n_nodes, n_feat, e_feat, n_edges):
    # Large tiles: per-grid-step overhead (~0.35 us) dominated the old (64, 512)
    # tiling; (128, 2048) keeps the double-buffered VMEM footprint < 2 MiB.
    tile_n = min(128, _round_up(n_nodes, 8))
    tile_e = min(2048, _round_up(max(n_edges, 1), 8))
    n_pad = _round_up(n_nodes, tile_n)
    e_pad = _round_up(max(n_edges, 1), tile_e)
    num_eb = e_pad // tile_e
    nt = n_pad // tile_n
    # No 128-lane padding of z (the last block dim equals the full array dim, so
    # the BlockSpec stays legal); only round to 8 for a clean weight layout.
    zpad = _round_up(2 * n_feat + e_feat, 8)

    dst = np.asarray(edge_index_np[1]).astype(np.int64)
    perm = np.argsort(dst, kind="stable")
    dst_s = dst[perm]

    counts = np.bincount(dst_s, minlength=n_pad)
    bounds = np.zeros(n_pad + 1, dtype=np.int64)
    bounds[1:] = np.cumsum(counts)

    node_start = bounds[:n_pad].astype(np.int32).reshape(n_pad, 1)
    node_end = bounds[1:].astype(np.int32).reshape(n_pad, 1)

    tidx = np.arange(nt)
    tile_lo = bounds[tidx * tile_n]
    tile_hi = bounds[(tidx + 1) * tile_n]
    blk_lo = (tile_lo // tile_e).astype(np.int32)
    blk_hi = -(-tile_hi // tile_e)                      # ceil div
    nblk = np.where(tile_hi > tile_lo, blk_hi - tile_lo // tile_e, 0).astype(np.int32)
    kmax = int(max(int(nblk.max()) if nblk.size else 0, 1))

    geom = _Geom(n_nodes, n_pad, e_pad, tile_n, tile_e, kmax, num_eb, zpad, n_feat)
    return geom, perm.astype(np.int32), blk_lo, nblk, node_start, node_end


def convolution_layer_forward(x, edge_index, edge_attr, params1, params2):
    """ConvolutionLayer.forward: conv1 -> dropout(id) -> conv2 -> dropout(id)."""
    n_nodes, n_feat = x.shape
    n_edges, e_feat = edge_attr.shape

    edge_index_np = np.asarray(jax.device_get(edge_index))
    geom, perm, blk_lo, nblk, node_start, node_end = _edge_geometry(
        edge_index_np, n_nodes, n_feat, e_feat, n_edges)

    pad_e = geom.e_pad - n_edges
    src_s = np.pad(edge_index_np[0][perm], (0, pad_e)).astype(np.int32)
    dst_s = np.pad(edge_index_np[1][perm], (0, pad_e)).astype(np.int32)

    # Edge attributes: sort by dst, pad the edge dim to e_pad and the lane dim by
    # the (at most 7) extra zpad lanes, cast to bf16 ONCE — reused by both layers,
    # so the in-JAX concat produces [e_pad, zpad] bf16 with no extra pad/cast pass.
    lane_pad = geom.zpad - (2 * n_feat + e_feat)
    edge_attr_s = jnp.pad(edge_attr[jnp.asarray(perm)].astype(jnp.bfloat16),
                          ((0, pad_e), (0, lane_pad)))

    return _forward_impl(geom, x, edge_attr_s,
                         jnp.asarray(src_s), jnp.asarray(dst_s),
                         jnp.asarray(blk_lo), jnp.asarray(nblk),
                         jnp.asarray(node_start), jnp.asarray(node_end),
                         params1, params2)


# --------------------------------------------------------------------------- #
# Params init + pure-JAX reference (f32) for a sanity check
# --------------------------------------------------------------------------- #
def init_cgconv_params(key, num_node_feature, num_edge_feature):
    F = num_node_feature
    D = num_edge_feature
    zdim = 2 * F + D
    k_wf, k_bf, k_ws, k_bs, k_g, k_b, k_m, k_v = jax.random.split(key, 8)
    lim = 1.0 / jnp.sqrt(zdim)
    return {
        "w_f": jax.random.uniform(k_wf, (zdim, F), jnp.float32, -lim, lim),
        "b_f": jax.random.uniform(k_bf, (F,), jnp.float32, -lim, lim),
        "w_s": jax.random.uniform(k_ws, (zdim, F), jnp.float32, -lim, lim),
        "b_s": jax.random.uniform(k_bs, (F,), jnp.float32, -lim, lim),
        "bn_gamma": 1.0 + 0.1 * jax.random.normal(k_g, (F,), jnp.float32),
        "bn_beta": 0.1 * jax.random.normal(k_b, (F,), jnp.float32),
        "bn_mean": 0.1 * jax.random.normal(k_m, (F,), jnp.float32),
        "bn_var": 1.0 + 0.1 * jax.random.uniform(k_v, (F,), jnp.float32),
    }


def _cgconv_reference(x, edge_index, edge_attr, params, eps=1e-5):
    src, dst = edge_index[0], edge_index[1]
    z = jnp.concatenate([x[dst], x[src], edge_attr], axis=-1)
    msg = (jax.nn.sigmoid(z @ params["w_f"] + params["b_f"])
           * jax.nn.softplus(z @ params["w_s"] + params["b_s"]))
    N, F = x.shape
    agg = jnp.zeros((N, F), jnp.float32).at[dst].add(msg)
    deg = jnp.zeros((N,), jnp.float32).at[dst].add(1.0)
    mean = agg / jnp.maximum(deg, 1.0)[:, None]
    scale = params["bn_gamma"] / jnp.sqrt(params["bn_var"] + eps)
    shift = params["bn_beta"] - params["bn_mean"] * scale
    return mean * scale + shift + x


if __name__ == "__main__":
    NUM_NODE_FEATURE = 32   # F
    NUM_EDGE_FEATURE = 8    # D
    N_NODES = 8
    N_EDGES = 16

    key = jax.random.PRNGKey(0)
    k_x, k_e, k_src, k_dst, k_p1, k_p2 = jax.random.split(key, 6)

    x = jax.random.normal(k_x, (N_NODES, NUM_NODE_FEATURE), jnp.float32)
    edge_attr = jax.random.normal(k_e, (N_EDGES, NUM_EDGE_FEATURE), jnp.float32)
    src = jax.random.randint(k_src, (N_EDGES,), 0, N_NODES)
    dst = jax.random.randint(k_dst, (N_EDGES,), 0, N_NODES)
    edge_index = jnp.stack([src, dst], axis=0)   # [2, E]

    params1 = init_cgconv_params(k_p1, NUM_NODE_FEATURE, NUM_EDGE_FEATURE)
    params2 = init_cgconv_params(k_p2, NUM_NODE_FEATURE, NUM_EDGE_FEATURE)

    out = convolution_layer_forward(x, edge_index, edge_attr, params1, params2)
    jax.block_until_ready(out)

    assert out.shape == (N_NODES, NUM_NODE_FEATURE)
    assert out.dtype == jnp.float32

    # f32 reference (kernel uses bf16 MXU operands -> loose tolerance)
    ref = _cgconv_reference(x, edge_index, edge_attr, params1)
    ref = _cgconv_reference(ref, edge_index, edge_attr, params2)
    np.testing.assert_allclose(np.asarray(out), np.asarray(ref), rtol=5e-2, atol=5e-2)

    print("KERNEL_OK")
</pallas_src>

<mosaic_0001>
module attributes {stable_mosaic.version = 11 : i64} {
  func.func @_cgconv_kernel(%arg0: i32, %arg1: i32, %arg2: memref<1xi32, #tpu.memory_space<smem>>, %arg3: memref<1xi32, #tpu.memory_space<smem>>, %arg4: memref<16x72xbf16, #tpu.memory_space<vmem>>, %arg5: memref<72x64xbf16, #tpu.memory_space<vmem>>, %arg6: memref<1x64xf32, #tpu.memory_space<vmem>>, %arg7: memref<8x1xi32, #tpu.memory_space<vmem>>, %arg8: memref<8x1xi32, #tpu.memory_space<vmem>>, %arg9: memref<1x32xf32, #tpu.memory_space<vmem>>, %arg10: memref<1x32xf32, #tpu.memory_space<vmem>>, %arg11: memref<8x32xf32, #tpu.memory_space<vmem>>, %arg12: memref<8x32xf32, #tpu.memory_space<vmem>>) attributes {dimension_semantics = [#tpu.dimension_semantics<parallel>, #tpu.dimension_semantics<arbitrary>], iteration_bounds = array<i64: 1, 1>, scalar_prefetch = 2 : i64, scratch_operands = 0 : i64, tpu.core_type = #tpu.core_type<tc>, window_params = [{transform_indices = @transform_0, window_bounds = array<i64: 16, 72>}, {pipeline_mode = #tpu.pipeline_mode<synchronous>, transform_indices = @transform_1, window_bounds = array<i64: 72, 64>}, {pipeline_mode = #tpu.pipeline_mode<synchronous>, transform_indices = @transform_2, window_bounds = array<i64: 1, 64>}, {transform_indices = @transform_3, window_bounds = array<i64: 8, 1>}, {transform_indices = @transform_4, window_bounds = array<i64: 8, 1>}, {pipeline_mode = #tpu.pipeline_mode<synchronous>, transform_indices = @transform_5, window_bounds = array<i64: 1, 32>}, {pipeline_mode = #tpu.pipeline_mode<synchronous>, transform_indices = @transform_6, window_bounds = array<i64: 1, 32>}, {transform_indices = @transform_7, window_bounds = array<i64: 8, 32>}, {transform_indices = @transform_8, window_bounds = array<i64: 8, 32>}]} {
    %c0_i32 = arith.constant 0 : i32
    %0 = arith.cmpi eq, %arg1, %c0_i32 : i32
    %1 = arith.extui %0 : i1 to i32
    %c0_i32_0 = arith.constant 0 : i32
    %2 = arith.cmpi ne, %1, %c0_i32_0 : i32
    scf.if %2 {
      %cst = arith.constant 0.000000e+00 : f32
      %11 = vector.broadcast %cst : f32 to vector<8x32xf32>
      %c0 = arith.constant 0 : index
      %c0_4 = arith.constant 0 : index
      %12 = vector.load %arg12[%c0, %c0_4] : memref<8x32xf32, #tpu.memory_space<vmem>>, vector<8x32xf32>
      tpu.vector_store %arg12[%c0, %c0_4], %11 {strides = array<i32>} : memref<8x32xf32, #tpu.memory_space<vmem>>, vector<8x32xf32>,
    } else {
    }
    %3 = arith.index_cast %arg0 : i32 to index
    %4 = memref.load %arg3[%3] : memref<1xi32, #tpu.memory_space<smem>>
    %5 = arith.cmpi slt, %arg1, %4 : i32
    %6 = arith.extui %5 : i1 to i32
    %c0_i32_1 = arith.constant 0 : i32
    %7 = arith.cmpi ne, %6, %c0_i32_1 : i32
    scf.if %7 {
      %c0 = arith.constant 0 : index
      %c0_4 = arith.constant 0 : index
      %11 = vector.load %arg4[%c0, %c0_4] : memref<16x72xbf16, #tpu.memory_space<vmem>>, vector<16x72xbf16>
      %c0_5 = arith.constant 0 : index
      %c0_6 = arith.constant 0 : index
      %12 = vector.load %arg5[%c0_5, %c0_6] : memref<72x64xbf16, #tpu.memory_space<vmem>>, vector<72x64xbf16>
      %cst = arith.constant dense<0.000000e+00> : vector<16x64xf32>
      %13 = tpu.matmul %11, %12, %cst {dimension_numbers = #tpu.dot_dimension_numbers<[1], [0], [0], [1], [0, 0, 1, 1], [], []>} : vector<16x72xbf16>, vector<72x64xbf16>, vector<16x64xf32> -> vector<16x64xf32>
      %c0_7 = arith.constant 0 : index
      %c0_8 = arith.constant 0 : index
      %14 = vector.load %arg6[%c0_7, %c0_8] : memref<1x64xf32, #tpu.memory_space<vmem>>, vector<1x64xf32>
      %15 = vector.broadcast %14 : vector<1x64xf32> to vector<16x64xf32>
      %16 = arith.addf %13, %15 : vector<16x64xf32>
      %17 = vector.extract_strided_slice %16 {offsets = [0, 0], sizes = [16, 32], strides = [1, 1]} : vector<16x64xf32> to vector<16x32xf32>
      %18 = arith.negf %17 : vector<16x32xf32>
      %19 = math.exp %18 : vector<16x32xf32>
      %cst_9 = arith.constant 1.000000e+00 : f32
      %20 = vector.broadcast %cst_9 : f32 to vector<16x32xf32>
      %21 = arith.addf %20, %19 : vector<16x32xf32>
      %22 = arith.divf %20, %21 : vector<16x32xf32>
      %23 = vector.extract_strided_slice %16 {offsets = [0, 32], sizes = [16, 32], strides = [1, 1]} : vector<16x64xf32> to vector<16x32xf32>
      %cst_10 = arith.constant 0.000000e+00 : f32
      %24 = vector.broadcast %cst_10 : f32 to vector<16x32xf32>
      %25 = arith.maximumf %23, %24 : vector<16x32xf32>
      %26 = vector.broadcast %cst_10 : f32 to vector<16x32xf32>
      %27 = arith.subf %23, %26 : vector<16x32xf32>
      %28 = arith.cmpf one, %27, %27 : vector<16x32xf32>
      %29 = vector.broadcast %cst_10 : f32 to vector<16x32xf32>
      %30 = arith.addf %23, %29 : vector<16x32xf32>
      %31 = math.absf %27 : vector<16x32xf32>
      %cst_11 = arith.constant 0.000000e+00 : f32
      %32 = vector.broadcast %cst_11 : f32 to vector<16x32xf32>
      %33 = arith.subf %32, %31 : vector<16x32xf32>
      %34 = math.exp %33 : vector<16x32xf32>
      %35 = math.log1p %34 : vector<16x32xf32>
      %36 = arith.addf %25, %35 : vector<16x32xf32>
      %37 = arith.select %28, %30, %36 : vector<16x32xi1>, vector<16x32xf32>
      %38 = arith.mulf %22, %37 : vector<16x32xf32>
      %39 = arith.truncf %38 : vector<16x32xf32> to vector<16x32xbf16>
      %40 = arith.index_cast %arg0 : i32 to index
      %41 = memref.load %arg2[%40] : memref<1xi32, #tpu.memory_space<smem>>
      %42 = arith.addi %41, %arg1 : i32
      %c16_i32 = arith.constant 16 : i32
      %43 = arith.muli %42, %c16_i32 : i32
      %44 = tpu.iota {dimensions = array<i32: 1>} : vector<8x16xi32>
      %45 = vector.broadcast %43 : i32 to vector<8x16xi32>
      %46 = arith.addi %44, %45 : vector<8x16xi32>
      %c0_12 = arith.constant 0 : index
      %c0_13 = arith.constant 0 : index
      %47 = vector.load %arg7[%c0_12, %c0_13] : memref<8x1xi32, #tpu.memory_space<vmem>>, vector<8x1xi32>
      %48 = vector.broadcast %47 : vector<8x1xi32> to vector<8x16xi32>
      %49 = arith.cmpi sge, %46, %48 : vector<8x16xi32>
      %c0_14 = arith.constant 0 : index
      %c0_15 = arith.constant 0 : index
      %50 = vector.load %arg8[%c0_14, %c0_15] : memref<8x1xi32, #tpu.memory_space<vmem>>, vector<8x1xi32>
      %51 = vector.broadcast %50 : vector<8x1xi32> to vector<8x16xi32>
      %52 = arith.cmpi slt, %46, %51 : vector<8x16xi32>
      %53 = arith.andi %49, %52 : vector<8x16xi1>
      %54 = arith.extui %53 : vector<8x16xi1> to vector<8x16xi32>
      %55 = arith.sitofp %54 : vector<8x16xi32> to vector<8x16xf32>
      %56 = arith.truncf %55 : vector<8x16xf32> to vector<8x16xbf16>
      %c0_16 = arith.constant 0 : index
      %c0_17 = arith.constant 0 : index
      %57 = vector.load %arg12[%c0_16, %c0_17] : memref<8x32xf32, #tpu.memory_space<vmem>>, vector<8x32xf32>
      %cst_18 = arith.constant dense<0.000000e+00> : vector<8x32xf32>
      %58 = tpu.matmul %56, %39, %cst_18 {dimension_numbers = #tpu.dot_dimension_numbers<[1], [0], [0], [1], [0, 0, 1, 1], [], []>} : vector<8x16xbf16>, vector<16x32xbf16>, vector<8x32xf32> -> vector<8x32xf32>
      %59 = arith.addf %57, %58 : vector<8x32xf32>
      %c0_19 = arith.constant 0 : index
      %c0_20 = arith.constant 0 : index
      %60 = vector.load %arg12[%c0_19, %c0_20] : memref<8x32xf32, #tpu.memory_space<vmem>>, vector<8x32xf32>
      tpu.vector_store %arg12[%c0_19, %c0_20], %59 {strides = array<i32>} : memref<8x32xf32, #tpu.memory_space<vmem>>, vector<8x32xf32>,
    } else {
    }
    %c0_i32_2 = arith.constant 0 : i32
    %8 = arith.cmpi eq, %arg1, %c0_i32_2 : i32
    %9 = arith.extui %8 : i1 to i32
    %c0_i32_3 = arith.constant 0 : i32
    %10 = arith.cmpi ne, %9, %c0_i32_3 : i32
    scf.if %10 {
      %c0 = arith.constant 0 : index
      %c0_4 = arith.constant 0 : index
      %11 = vector.load %arg8[%c0, %c0_4] : memref<8x1xi32, #tpu.memory_space<vmem>>, vector<8x1xi32>
      %c0_5 = arith.constant 0 : index
      %c0_6 = arith.constant 0 : index
      %12 = vector.load %arg7[%c0_5, %c0_6] : memref<8x1xi32, #tpu.memory_space<vmem>>, vector<8x1xi32>
      %13 = arith.subi %11, %12 : vector<8x1xi32>
      %14 = arith.sitofp %13 : vector<8x1xi32> to vector<8x1xf32>
      %c0_7 = arith.constant 0 : index
      %c0_8 = arith.constant 0 : index
      %15 = vector.load %arg12[%c0_7, %c0_8] : memref<8x32xf32, #tpu.memory_space<vmem>>, vector<8x32xf32>
      %cst = arith.constant 1.000000e+00 : f32
      %16 = vector.broadcast %cst : f32 to vector<8x1xf32>
      %17 = arith.maximumf %14, %16 : vector<8x1xf32>
      %cst_9 = arith.constant 1.000000e+00 : f32
      %18 = vector.broadcast %cst_9 : f32 to vector<8x1xf32>
      %19 = arith.divf %18, %17 : vector<8x1xf32>
      %20 = vector.broadcast %19 : vector<8x1xf32> to vector<8x32xf32>
      %21 = arith.mulf %15, %20 : vector<8x32xf32>
      %c0_10 = arith.constant 0 : index
      %c0_11 = arith.constant 0 : index
      %22 = vector.load %arg9[%c0_10, %c0_11] : memref<1x32xf32, #tpu.memory_space<vmem>>, vector<1x32xf32>
      %23 = vector.broadcast %22 : vector<1x32xf32> to vector<8x32xf32>
      %24 = arith.mulf %21, %23 : vector<8x32xf32>
      %c0_12 = arith.constant 0 : index
      %c0_13 = arith.constant 0 : index
      %25 = vector.load %arg10[%c0_12, %c0_13] : memref<1x32xf32, #tpu.memory_space<vmem>>, vector<1x32xf32>
      %26 = vector.broadcast %25 : vector<1x32xf32> to vector<8x32xf32>
      %27 = arith.addf %24, %26 : vector<8x32xf32>
      %c0_14 = arith.constant 0 : index
      %c0_15 = arith.constant 0 : index
      %28 = vector.load %arg11[%c0_14, %c0_15] : memref<8x32xf32, #tpu.memory_space<vmem>>, vector<8x32xf32>
      %29 = arith.addf %27, %28 : vector<8x32xf32>
      %c0_16 = arith.constant 0 : index
      %c0_17 = arith.constant 0 : index
      %30 = vector.load %arg12[%c0_16, %c0_17] : memref<8x32xf32, #tpu.memory_space<vmem>>, vector<8x32xf32>
      tpu.vector_store %arg12[%c0_16, %c0_17], %29 {strides = array<i32>} : memref<8x32xf32, #tpu.memory_space<vmem>>, vector<8x32xf32>,
    } else {
    }
    return
  }
  func.func @transform_0(%arg0: i32, %arg1: i32, %arg2: memref<1xi32, #tpu.memory_space<smem>>, %arg3: memref<1xi32, #tpu.memory_space<smem>>) -> (i32, i32) {
    %0 = arith.index_cast %arg0 : i32 to index
    %1 = memref.load %arg2[%0] : memref<1xi32, #tpu.memory_space<smem>>
    %2 = arith.index_cast %arg0 : i32 to index
    %3 = memref.load %arg3[%2] : memref<1xi32, #tpu.memory_space<smem>>
    %c1_i32 = arith.constant 1 : i32
    %4 = arith.maxsi %3, %c1_i32 : i32
    %5 = arith.addi %1, %4 : i32
    %c1_i32_0 = arith.constant 1 : i32
    %6 = arith.subi %5, %c1_i32_0 : i32
    %c0_i32 = arith.constant 0 : i32
    %7 = arith.minsi %6, %c0_i32 : i32
    %8 = arith.index_cast %arg0 : i32 to index
    %9 = memref.load %arg2[%8] : memref<1xi32, #tpu.memory_space<smem>>
    %10 = arith.addi %9, %arg1 : i32
    %11 = arith.minsi %10, %7 : i32
    %c0_i32_1 = arith.constant 0 : i32
    %c0_i32_2 = arith.constant 0 : i32
    return %11, %c0_i32_1 : i32, i32
  }
  func.func @transform_1(%arg0: i32, %arg1: i32, %arg2: memref<1xi32, #tpu.memory_space<smem>>, %arg3: memref<1xi32, #tpu.memory_space<smem>>) -> (i32, i32) {
    %c0_i32 = arith.constant 0 : i32
    %c0_i32_0 = arith.constant 0 : i32
    %c0_i32_1 = arith.constant 0 : i32
    return %c0_i32, %c0_i32_0 : i32, i32
  }
  func.func @transform_2(%arg0: i32, %arg1: i32, %arg2: memref<1xi32, #tpu.memory_space<smem>>, %arg3: memref<1xi32, #tpu.memory_space<smem>>) -> (i32, i32) {
    %c0_i32 = arith.constant 0 : i32
    %c0_i32_0 = arith.constant 0 : i32
    %c0_i32_1 = arith.constant 0 : i32
    return %c0_i32, %c0_i32_0 : i32, i32
  }
  func.func @transform_3(%arg0: i32, %arg1: i32, %arg2: memref<1xi32, #tpu.memory_space<smem>>, %arg3: memref<1xi32, #tpu.memory_space<smem>>) -> (i32, i32) {
    %c0_i32 = arith.constant 0 : i32
    %c0_i32_0 = arith.constant 0 : i32
    return %arg0, %c0_i32 : i32, i32
  }
  func.func @transform_4(%arg0: i32, %arg1: i32, %arg2: memref<1xi32, #tpu.memory_space<smem>>, %arg3: memref<1xi32, #tpu.memory_space<smem>>) -> (i32, i32) {
    %c0_i32 = arith.constant 0 : i32
    %c0_i32_0 = arith.constant 0 : i32
    return %arg0, %c0_i32 : i32, i32
  }
  func.func @transform_5(%arg0: i32, %arg1: i32, %arg2: memref<1xi32, #tpu.memory_space<smem>>, %arg3: memref<1xi32, #tpu.memory_space<smem>>) -> (i32, i32) {
    %c0_i32 = arith.constant 0 : i32
    %c0_i32_0 = arith.constant 0 : i32
    %c0_i32_1 = arith.constant 0 : i32
    return %c0_i32, %c0_i32_0 : i32, i32
  }
  func.func @transform_6(%arg0: i32, %arg1: i32, %arg2: memref<1xi32, #tpu.memory_space<smem>>, %arg3: memref<1xi32, #tpu.memory_space<smem>>) -> (i32, i32) {
    %c0_i32 = arith.constant 0 : i32
    %c0_i32_0 = arith.constant 0 : i32
    %c0_i32_1 = arith.constant 0 : i32
    return %c0_i32, %c0_i32_0 : i32, i32
  }
  func.func @transform_7(%arg0: i32, %arg1: i32, %arg2: memref<1xi32, #tpu.memory_space<smem>>, %arg3: memref<1xi32, #tpu.memory_space<smem>>) -> (i32, i32) {
    %c0_i32 = arith.constant 0 : i32
    %c0_i32_0 = arith.constant 0 : i32
    return %arg0, %c0_i32 : i32, i32
  }
  func.func @transform_8(%arg0: i32, %arg1: i32, %arg2: memref<1xi32, #tpu.memory_space<smem>>, %arg3: memref<1xi32, #tpu.memory_space<smem>>) -> (i32, i32) {
    %c0_i32 = arith.constant 0 : i32
    %c0_i32_0 = arith.constant 0 : i32
    return %arg0, %c0_i32 : i32, i32
  }
}

module attributes {stable_mosaic.version = 11 : i64} {
  func.func @_cgconv_kernel(%arg0: i32, %arg1: i32, %arg2: memref<1xi32, #tpu.memory_space<smem>>, %arg3: memref<1xi32, #tpu.memory_space<smem>>, %arg4: memref<16x72xbf16, #tpu.memory_space<vmem>>, %arg5: memref<72x64xbf16, #tpu.memory_space<vmem>>, %arg6: memref<1x64xf32, #tpu.memory_space<vmem>>, %arg7: memref<8x1xi32, #tpu.memory_space<vmem>>, %arg8: memref<8x1xi32, #tpu.memory_space<vmem>>, %arg9: memref<1x32xf32, #tpu.memory_space<vmem>>, %arg10: memref<1x32xf32, #tpu.memory_space<vmem>>, %arg11: memref<8x32xf32, #tpu.memory_space<vmem>>, %arg12: memref<8x32xf32, #tpu.memory_space<vmem>>) attributes {dimension_semantics = [#tpu.dimension_semantics<parallel>, #tpu.dimension_semantics<arbitrary>], iteration_bounds = array<i64: 1, 1>, scalar_prefetch = 2 : i64, scratch_operands = 0 : i64, tpu.core_type = #tpu.core_type<tc>, window_params = [{transform_indices = @transform_0, window_bounds = array<i64: 16, 72>}, {pipeline_mode = #tpu.pipeline_mode<synchronous>, transform_indices = @transform_1, window_bounds = array<i64: 72, 64>}, {pipeline_mode = #tpu.pipeline_mode<synchronous>, transform_indices = @transform_2, window_bounds = array<i64: 1, 64>}, {transform_indices = @transform_3, window_bounds = array<i64: 8, 1>}, {transform_indices = @transform_4, window_bounds = array<i64: 8, 1>}, {pipeline_mode = #tpu.pipeline_mode<synchronous>, transform_indices = @transform_5, window_bounds = array<i64: 1, 32>}, {pipeline_mode = #tpu.pipeline_mode<synchronous>, transform_indices = @transform_6, window_bounds = array<i64: 1, 32>}, {transform_indices = @transform_7, window_bounds = array<i64: 8, 32>}, {transform_indices = @transform_8, window_bounds = array<i64: 8, 32>}]} {
    %c0_i32 = arith.constant 0 : i32
    %0 = arith.cmpi eq, %arg1, %c0_i32 : i32
    %1 = arith.extui %0 : i1 to i32
    %c0_i32_0 = arith.constant 0 : i32
    %2 = arith.cmpi ne, %1, %c0_i32_0 : i32
    scf.if %2 {
      %cst = arith.constant 0.000000e+00 : f32
      %11 = vector.broadcast %cst : f32 to vector<8x32xf32>
      %c0 = arith.constant 0 : index
      %c0_4 = arith.constant 0 : index
      %12 = vector.load %arg12[%c0, %c0_4] : memref<8x32xf32, #tpu.memory_space<vmem>>, vector<8x32xf32>
      tpu.vector_store %arg12[%c0, %c0_4], %11 {strides = array<i32>} : memref<8x32xf32, #tpu.memory_space<vmem>>, vector<8x32xf32>,
    } else {
    }
    %3 = arith.index_cast %arg0 : i32 to index
    %4 = memref.load %arg3[%3] : memref<1xi32, #tpu.memory_space<smem>>
    %5 = arith.cmpi slt, %arg1, %4 : i32
    %6 = arith.extui %5 : i1 to i32
    %c0_i32_1 = arith.constant 0 : i32
    %7 = arith.cmpi ne, %6, %c0_i32_1 : i32
    scf.if %7 {
      %c0 = arith.constant 0 : index
      %c0_4 = arith.constant 0 : index
      %11 = vector.load %arg4[%c0, %c0_4] : memref<16x72xbf16, #tpu.memory_space<vmem>>, vector<16x72xbf16>
      %c0_5 = arith.constant 0 : index
      %c0_6 = arith.constant 0 : index
      %12 = vector.load %arg5[%c0_5, %c0_6] : memref<72x64xbf16, #tpu.memory_space<vmem>>, vector<72x64xbf16>
      %cst = arith.constant dense<0.000000e+00> : vector<16x64xf32>
      %13 = tpu.matmul %11, %12, %cst {dimension_numbers = #tpu.dot_dimension_numbers<[1], [0], [0], [1], [0, 0, 1, 1], [], []>} : vector<16x72xbf16>, vector<72x64xbf16>, vector<16x64xf32> -> vector<16x64xf32>
      %c0_7 = arith.constant 0 : index
      %c0_8 = arith.constant 0 : index
      %14 = vector.load %arg6[%c0_7, %c0_8] : memref<1x64xf32, #tpu.memory_space<vmem>>, vector<1x64xf32>
      %15 = vector.broadcast %14 : vector<1x64xf32> to vector<16x64xf32>
      %16 = arith.addf %13, %15 : vector<16x64xf32>
      %17 = vector.extract_strided_slice %16 {offsets = [0, 0], sizes = [16, 32], strides = [1, 1]} : vector<16x64xf32> to vector<16x32xf32>
      %18 = arith.negf %17 : vector<16x32xf32>
      %19 = math.exp %18 : vector<16x32xf32>
      %cst_9 = arith.constant 1.000000e+00 : f32
      %20 = vector.broadcast %cst_9 : f32 to vector<16x32xf32>
      %21 = arith.addf %20, %19 : vector<16x32xf32>
      %22 = arith.divf %20, %21 : vector<16x32xf32>
      %23 = vector.extract_strided_slice %16 {offsets = [0, 32], sizes = [16, 32], strides = [1, 1]} : vector<16x64xf32> to vector<16x32xf32>
      %cst_10 = arith.constant 0.000000e+00 : f32
      %24 = vector.broadcast %cst_10 : f32 to vector<16x32xf32>
      %25 = arith.maximumf %23, %24 : vector<16x32xf32>
      %26 = vector.broadcast %cst_10 : f32 to vector<16x32xf32>
      %27 = arith.subf %23, %26 : vector<16x32xf32>
      %28 = arith.cmpf one, %27, %27 : vector<16x32xf32>
      %29 = vector.broadcast %cst_10 : f32 to vector<16x32xf32>
      %30 = arith.addf %23, %29 : vector<16x32xf32>
      %31 = math.absf %27 : vector<16x32xf32>
      %cst_11 = arith.constant 0.000000e+00 : f32
      %32 = vector.broadcast %cst_11 : f32 to vector<16x32xf32>
      %33 = arith.subf %32, %31 : vector<16x32xf32>
      %34 = math.exp %33 : vector<16x32xf32>
      %35 = math.log1p %34 : vector<16x32xf32>
      %36 = arith.addf %25, %35 : vector<16x32xf32>
      %37 = arith.select %28, %30, %36 : vector<16x32xi1>, vector<16x32xf32>
      %38 = arith.mulf %22, %37 : vector<16x32xf32>
      %39 = arith.truncf %38 : vector<16x32xf32> to vector<16x32xbf16>
      %40 = arith.index_cast %arg0 : i32 to index
      %41 = memref.load %arg2[%40] : memref<1xi32, #tpu.memory_space<smem>>
      %42 = arith.addi %41, %arg1 : i32
      %c16_i32 = arith.constant 16 : i32
      %43 = arith.muli %42, %c16_i32 : i32
      %44 = tpu.iota {dimensions = array<i32: 1>} : vector<8x16xi32>
      %45 = vector.broadcast %43 : i32 to vector<8x16xi32>
      %46 = arith.addi %44, %45 : vector<8x16xi32>
      %c0_12 = arith.constant 0 : index
      %c0_13 = arith.constant 0 : index
      %47 = vector.load %arg7[%c0_12, %c0_13] : memref<8x1xi32, #tpu.memory_space<vmem>>, vector<8x1xi32>
      %48 = vector.broadcast %47 : vector<8x1xi32> to vector<8x16xi32>
      %49 = arith.cmpi sge, %46, %48 : vector<8x16xi32>
      %c0_14 = arith.constant 0 : index
      %c0_15 = arith.constant 0 : index
      %50 = vector.load %arg8[%c0_14, %c0_15] : memref<8x1xi32, #tpu.memory_space<vmem>>, vector<8x1xi32>
      %51 = vector.broadcast %50 : vector<8x1xi32> to vector<8x16xi32>
      %52 = arith.cmpi slt, %46, %51 : vector<8x16xi32>
      %53 = arith.andi %49, %52 : vector<8x16xi1>
      %54 = arith.extui %53 : vector<8x16xi1> to vector<8x16xi32>
      %55 = arith.sitofp %54 : vector<8x16xi32> to vector<8x16xf32>
      %56 = arith.truncf %55 : vector<8x16xf32> to vector<8x16xbf16>
      %c0_16 = arith.constant 0 : index
      %c0_17 = arith.constant 0 : index
      %57 = vector.load %arg12[%c0_16, %c0_17] : memref<8x32xf32, #tpu.memory_space<vmem>>, vector<8x32xf32>
      %cst_18 = arith.constant dense<0.000000e+00> : vector<8x32xf32>
      %58 = tpu.matmul %56, %39, %cst_18 {dimension_numbers = #tpu.dot_dimension_numbers<[1], [0], [0], [1], [0, 0, 1, 1], [], []>} : vector<8x16xbf16>, vector<16x32xbf16>, vector<8x32xf32> -> vector<8x32xf32>
      %59 = arith.addf %57, %58 : vector<8x32xf32>
      %c0_19 = arith.constant 0 : index
      %c0_20 = arith.constant 0 : index
      %60 = vector.load %arg12[%c0_19, %c0_20] : memref<8x32xf32, #tpu.memory_space<vmem>>, vector<8x32xf32>
      tpu.vector_store %arg12[%c0_19, %c0_20], %59 {strides = array<i32>} : memref<8x32xf32, #tpu.memory_space<vmem>>, vector<8x32xf32>,
    } else {
    }
    %c0_i32_2 = arith.constant 0 : i32
    %8 = arith.cmpi eq, %arg1, %c0_i32_2 : i32
    %9 = arith.extui %8 : i1 to i32
    %c0_i32_3 = arith.constant 0 : i32
    %10 = arith.cmpi ne, %9, %c0_i32_3 : i32
    scf.if %10 {
      %c0 = arith.constant 0 : index
      %c0_4 = arith.constant 0 : index
      %11 = vector.load %arg8[%c0, %c0_4] : memref<8x1xi32, #tpu.memory_space<vmem>>, vector<8x1xi32>
      %c0_5 = arith.constant 0 : index
      %c0_6 = arith.constant 0 : index
      %12 = vector.load %arg7[%c0_5, %c0_6] : memref<8x1xi32, #tpu.memory_space<vmem>>, vector<8x1xi32>
      %13 = arith.subi %11, %12 : vector<8x1xi32>
      %14 = arith.sitofp %13 : vector<8x1xi32> to vector<8x1xf32>
      %c0_7 = arith.constant 0 : index
      %c0_8 = arith.constant 0 : index
      %15 = vector.load %arg12[%c0_7, %c0_8] : memref<8x32xf32, #tpu.memory_space<vmem>>, vector<8x32xf32>
      %cst = arith.constant 1.000000e+00 : f32
      %16 = vector.broadcast %cst : f32 to vector<8x1xf32>
      %17 = arith.maximumf %14, %16 : vector<8x1xf32>
      %cst_9 = arith.constant 1.000000e+00 : f32
      %18 = vector.broadcast %cst_9 : f32 to vector<8x1xf32>
      %19 = arith.divf %18, %17 : vector<8x1xf32>
      %20 = vector.broadcast %19 : vector<8x1xf32> to vector<8x32xf32>
      %21 = arith.mulf %15, %20 : vector<8x32xf32>
      %c0_10 = arith.constant 0 : index
      %c0_11 = arith.constant 0 : index
      %22 = vector.load %arg9[%c0_10, %c0_11] : memref<1x32xf32, #tpu.memory_space<vmem>>, vector<1x32xf32>
      %23 = vector.broadcast %22 : vector<1x32xf32> to vector<8x32xf32>
      %24 = arith.mulf %21, %23 : vector<8x32xf32>
      %c0_12 = arith.constant 0 : index
      %c0_13 = arith.constant 0 : index
      %25 = vector.load %arg10[%c0_12, %c0_13] : memref<1x32xf32, #tpu.memory_space<vmem>>, vector<1x32xf32>
      %26 = vector.broadcast %25 : vector<1x32xf32> to vector<8x32xf32>
      %27 = arith.addf %24, %26 : vector<8x32xf32>
      %c0_14 = arith.constant 0 : index
      %c0_15 = arith.constant 0 : index
      %28 = vector.load %arg11[%c0_14, %c0_15] : memref<8x32xf32, #tpu.memory_space<vmem>>, vector<8x32xf32>
      %29 = arith.addf %27, %28 : vector<8x32xf32>
      %c0_16 = arith.constant 0 : index
      %c0_17 = arith.constant 0 : index
      %30 = vector.load %arg12[%c0_16, %c0_17] : memref<8x32xf32, #tpu.memory_space<vmem>>, vector<8x32xf32>
      tpu.vector_store %arg12[%c0_16, %c0_17], %29 {strides = array<i32>} : memref<8x32xf32, #tpu.memory_space<vmem>>, vector<8x32xf32>,
    } else {
    }
    return
  }
  func.func @transform_0(%arg0: i32, %arg1: i32, %arg2: memref<1xi32, #tpu.memory_space<smem>>, %arg3: memref<1xi32, #tpu.memory_space<smem>>) -> (i32, i32) {
    %0 = arith.index_cast %arg0 : i32 to index
    %1 = memref.load %arg2[%0] : memref<1xi32, #tpu.memory_space<smem>>
    %2 = arith.index_cast %arg0 : i32 to index
    %3 = memref.load %arg3[%2] : memref<1xi32, #tpu.memory_space<smem>>
    %c1_i32 = arith.constant 1 : i32
    %4 = arith.maxsi %3, %c1_i32 : i32
    %5 = arith.addi %1, %4 : i32
    %c1_i32_0 = arith.constant 1 : i32
    %6 = arith.subi %5, %c1_i32_0 : i32
    %c0_i32 = arith.constant 0 : i32
    %7 = arith.minsi %6, %c0_i32 : i32
    %8 = arith.index_cast %arg0 : i32 to index
    %9 = memref.load %arg2[%8] : memref<1xi32, #tpu.memory_space<smem>>
    %10 = arith.addi %9, %arg1 : i32
    %11 = arith.minsi %10, %7 : i32
    %c0_i32_1 = arith.constant 0 : i32
    %c0_i32_2 = arith.constant 0 : i32
    return %11, %c0_i32_1 : i32, i32
  }
  func.func @transform_1(%arg0: i32, %arg1: i32, %arg2: memref<1xi32, #tpu.memory_space<smem>>, %arg3: memref<1xi32, #tpu.memory_space<smem>>) -> (i32, i32) {
    %c0_i32 = arith.constant 0 : i32
    %c0_i32_0 = arith.constant 0 : i32
    %c0_i32_1 = arith.constant 0 : i32
    return %c0_i32, %c0_i32_0 : i32, i32
  }
  func.func @transform_2(%arg0: i32, %arg1: i32, %arg2: memref<1xi32, #tpu.memory_space<smem>>, %arg3: memref<1xi32, #tpu.memory_space<smem>>) -> (i32, i32) {
    %c0_i32 = arith.constant 0 : i32
    %c0_i32_0 = arith.constant 0 : i32
    %c0_i32_1 = arith.constant 0 : i32
    return %c0_i32, %c0_i32_0 : i32, i32
  }
  func.func @transform_3(%arg0: i32, %arg1: i32, %arg2: memref<1xi32, #tpu.memory_space<smem>>, %arg3: memref<1xi32, #tpu.memory_space<smem>>) -> (i32, i32) {
    %c0_i32 = arith.constant 0 : i32
    %c0_i32_0 = arith.constant 0 : i32
    return %arg0, %c0_i32 : i32, i32
  }
  func.func @transform_4(%arg0: i32, %arg1: i32, %arg2: memref<1xi32, #tpu.memory_space<smem>>, %arg3: memref<1xi32, #tpu.memory_space<smem>>) -> (i32, i32) {
    %c0_i32 = arith.constant 0 : i32
    %c0_i32_0 = arith.constant 0 : i32
    return %arg0, %c0_i32 : i32, i32
  }
  func.func @transform_5(%arg0: i32, %arg1: i32, %arg2: memref<1xi32, #tpu.memory_space<smem>>, %arg3: memref<1xi32, #tpu.memory_space<smem>>) -> (i32, i32) {
    %c0_i32 = arith.constant 0 : i32
    %c0_i32_0 = arith.constant 0 : i32
    %c0_i32_1 = arith.constant 0 : i32
    return %c0_i32, %c0_i32_0 : i32, i32
  }
  func.func @transform_6(%arg0: i32, %arg1: i32, %arg2: memref<1xi32, #tpu.memory_space<smem>>, %arg3: memref<1xi32, #tpu.memory_space<smem>>) -> (i32, i32) {
    %c0_i32 = arith.constant 0 : i32
    %c0_i32_0 = arith.constant 0 : i32
    %c0_i32_1 = arith.constant 0 : i32
    return %c0_i32, %c0_i32_0 : i32, i32
  }
  func.func @transform_7(%arg0: i32, %arg1: i32, %arg2: memref<1xi32, #tpu.memory_space<smem>>, %arg3: memref<1xi32, #tpu.memory_space<smem>>) -> (i32, i32) {
    %c0_i32 = arith.constant 0 : i32
    %c0_i32_0 = arith.constant 0 : i32
    return %arg0, %c0_i32 : i32, i32
  }
  func.func @transform_8(%arg0: i32, %arg1: i32, %arg2: memref<1xi32, #tpu.memory_space<smem>>, %arg3: memref<1xi32, #tpu.memory_space<smem>>) -> (i32, i32) {
    %c0_i32 = arith.constant 0 : i32
    %c0_i32_0 = arith.constant 0 : i32
    return %arg0, %c0_i32 : i32, i32
  }
}

</mosaic_0001>

<bundles_post_ra>
// kernel: _forward_impl.3
= control target key start
LH: loop header
LB: loop body
LE: loop exit
PB: predicated region body
PF: predicated region fallthrough
CT: control target
= control target key end

     0   :  { %s647_s0 = inlined_call_operand.<no memory space> [shape: s32[1], index: 0, kind: input, shape index: {}]   ;;  %s648_s1 = inlined_call_operand.<no memory space> [shape: s32[1], index: 1, kind: input, shape index: {}]   ;;  %s649_s2 = inlined_call_operand.vmem [shape: bf16[16,72], index: 2, kind: input, shape index: {}]   ;;  %s650_s3 = inlined_call_operand.vmem [shape: bf16[72,64], index: 3, kind: input, shape index: {}]   ;;  %s651_s4 = inlined_call_operand.vmem [shape: f32[1,64], index: 4, kind: input, shape index: {}]   ;;  %s652_s5 = inlined_call_operand.vmem [shape: s32[8,1], index: 5, kind: input, shape index: {}]   ;;  %s653_s6 = inlined_call_operand.vmem [shape: s32[8,1], index: 6, kind: input, shape index: {}]   ;;  %s654_s7 = inlined_call_operand.vmem [shape: f32[1,32], index: 7, kind: input, shape index: {}]   ;;  %s655_s8 = inlined_call_operand.vmem [shape: f32[1,32], index: 8, kind: input, shape index: {}]   ;;  %s656_s9 = inlined_call_operand.vmem [shape: f32[8,32], index: 9, kind: input, shape index: {}]   ;;  %s657_s10 = inlined_call_operand.hbm [shape: f32[8,32], index: 10, kind: output, shape index: {}]  }
   0x1   :  { %15 = sst [smem:[#allocation3]] %s647_s0 }
   0x2   :  { %17 = vsyncpa [#allocation6], 0  ;;  %s78_s15 = sld [smem:[#allocation3]]  ;;  %p80_p0 = scmp.gt.s32.totalorder %s648_s1, 1  ;;  %vm111_vm0 = vcmask 261120   ;;  %v507_v0 = vmov 0.0  }
   0x3   :  { %112 = vst.msk [vmem:[#allocation5] sm:$0xff] %vm111_vm0, %v507_v0  ;;  %p406_p4 = scmp.le.s32.totalorder %s648_s1, 0 }
   0x4   :  { %s81_s20 = scalar_select %p80_p0, %s648_s1, 1 }
   0x5   :  { %v458_v1 = vld [vmem:[%s650_s3] sm:$0xff] (!%p406_p4)   ;;  %v508_v2 = vmov (!%p406_p4), 0.0   ;;  %v459_v3 = vld [vmem:[%s650_s3 + $0x8] sm:$0xff] (!%p406_p4)   ;;  %vm509_vm1 = vmmov (!%p406_p4), 0   ;;  %v460_v4 = vld [vmem:[%s650_s3 + $0x10] sm:$0xff] (!%p406_p4)   ;;  %vm172_vm2 = vcmask (!%p406_p4), 1043456   ;;  %v279_v53 = vlaneseq (!%p406_p4) }
   0x6   :  { %430 = vmatprep.subr.bf16.mxu0 (!%p406_p4), %v508_v2  ;;  %444 = vmatprep.subr.bf16.mxu1 (!%p406_p4), %v508_v2  ;;  %v461_v5 = vld [vmem:[%s650_s3 + $0x18] sm:$0xff] (!%p406_p4)   ;;  %v462_v6 = vld [vmem:[%s650_s3 + $0x20] ss:$0 sps:$4 sm:$0xff] (!%p406_p4)   ;;  %vm168_vm3 = vcmask (!%p406_p4), 588800   ;;  %v510_v10 = vmov (!%p406_p4), 0   ;;  %vm298_vm11 = vcmask (!%p406_p4), 130048  }
   0x7   :  { %431 = vmatpush3.bf16.msra.mxu0 (!%p406_p4), %v458_v1  ;;  %440 = vmatprep.mubr.msk.bf16.mxu0 (!%p406_p4), %vm509_vm1, %v508_v2  ;;  %v174_v7 = vsel (!%p406_p4), %vm172_vm2, %v462_v6, 0  ;;  %v283_v9 = vld [vmem:[%s652_s5] sm:$0xff] (!%p406_p4)  ;;  %v280_v57 = vand.u32 (!%p406_p4), 127, %v279_v53 }
   0x8   :  { %s82_s21 = sadd.s32 %s81_s20, %s78_s15  ;;  %432 = vmatprep.subr.bf16.mxu0 (!%p406_p4), %v508_v2  ;;  %446 = vmatprep.mubr.msk.bf16.mxu1 (!%p406_p4), %vm509_vm1, %v508_v2  ;;  %v288_v11 = vld [vmem:[%s653_s6] sm:$0xff] (!%p406_p4) }
   0x9   :  { %s402_s22 = sadd.s32 4294967295, %s82_s21  ;;  %457 = vset.pattern.permute.xlu0 (!%p406_p4), %v510_v10  ;;  %v407_v12 = vld [vmem:[%s651_s4] ss:$0 sm:$0xff] (!%p406_p4)  ;;  %s511_s4 = smov (!%p406_p4), 96  }
   0xa   :  { %p84_p1 = scmp.lt.s32.totalorder %s402_s22, 0  ;;  %285 = vperm.xlu0 (!%p406_p4), %457, %v283_v9  }
   0xb   :  { %433 = vmatpush3.bf16.msra.mxu0 (!%p406_p4), %v459_v3 }
   0xc   :  { %s659_s22 = smov (!%p84_p1, %s402_s22), 0  ;;  %434 = vmatprep.subr.bf16.mxu0 (!%p406_p4), %v508_v2 }
   0xd   :  { %p87_p2 = scmp.lt.s32.totalorder %s78_s15, %s659_s22 }
   0xe   :  { %290 = vperm.xlu0 (!%p406_p4), %457, %v288_v11  }
   0xf   :  { %s661_s15 = smov (!%p87_p2, %s78_s15), %s659_s22  ;;  %117 = sbr.rel (%p406_p4) target bundleno = 618 (0x26a), region = 41 }
  0x10   :  { %s403_s0 = sshll.u32 %s661_s15, 1  ;;  %435 = vmatpush3.bf16.msra.mxu0 (!%p406_p4), %v460_v4  ;;  %s276_s22 = sld [smem:[#allocation3]] (!%p406_p4) }
  0x11   :  { %p90_p3 = scmp.lt.s32.totalorder %s403_s0, 1  ;;  %436 = vmatprep.subr.bf16.mxu0 (!%p406_p4), %v508_v2 }
  0x13   :  { %s663_s0 = smov (!%p90_p3, %s403_s0), 1 }
  0x14   :  { %s404_s23 = sshll.u32 %s663_s0, 2  ;;  %437 = vmatpush3.bf16.msra.mxu0 (!%p406_p4), %v461_v5 }
  0x15   :  { %s93_s26 = scalar_lea.vmem %s649_s2, %s404_s23  ;;  %438 = vmatprep.subr.bf16.mxu0 (!%p406_p4), %v508_v2 }
  0x16   :  { %v463_v8 = vld [vmem:[%s93_s26] sm:$0xff]   ;;  %s417_s0 = sshll.u32 %s276_s22, 4 }
  0x17   :  { %v281_v58 = vstv %s417_s0 }
  0x18   :  { %439 = vmatpush3.bf16.msra.mxu0 %v174_v7  ;;  %v282_v59 = vadd.s32 %v281_v58, %v280_v57  ;;  %v297_v7 = vld [vmem:[#allocation5] sm:$0xff] }
  0x1b   :  { %441 = vmatmul.mubr.msk.bf16.vlgmr.msra.gmra.mrb[0].mxu0 %vm168_vm3, %v463_v8 }
  0x89   :  { %v286_v56 = vpop.permute.xlu0 %285 }
  0x8a   :  { %vm287_vm8 = vcmp.ge.s32.totalorder %v282_v59, %v286_v56 }
  0x8d   :  { %v291_v60 = vpop.permute.xlu0 %290 }
  0x8e   :  { %vm292_vm9 = vcmp.lt.s32.totalorder %v282_v59, %v291_v60 }
  0x8f   :  { %vm293_vm10 = vmand %vm287_vm8, %vm292_vm9 }
  0x90   :  { %v418_v4 = vsel %vm293_vm10, 1.0, %v508_v2 }
  0x91   :  { %v296_v6 = vpack.c.bf16 %v418_v4, %v418_v4 }
  0xee   :  { %v210_v13 = vpop.f32.mrb[0].mxu0 }
  0xef   :  { %v211_v14 = vadd.f32 %v407_v12, %v210_v13  ;;  %v442_v15 = vpop.f32.mrb[1].mxu0 }
  0xf0   :  { %v213_v16 = vpop.f32.mrb[2].mxu0 }
  0xf1   :  { %v235_v17 = vand.u32 2147483647, %v211_v14  ;;  %v214_v18 = vadd.f32 %v407_v12, %v213_v16  ;;  %v443_v19 = vpop.f32.mrb[3].mxu0  ;;  %v229_v39 = vmax.f32 %v211_v14, 0.0  ;;  %vm231_vm6 = vcmp.ne.f32.partialorder %v211_v14, %v211_v14 }
  0xf2   :  { %v415_v49 = vmul.f32 -1.442695, %v211_v14 }
  0xf3   :  { %v237_v20 = vsub.f32 0.0, %v235_v17  ;;  %v236_v21 = vand.u32 2147483647, %v214_v18  ;;  %v230_v44 = vmax.f32 %v214_v18, 0.0  ;;  %vm232_vm7 = vcmp.ne.f32.partialorder %v214_v18, %v214_v18 }
  0xf4   :  { %v416_v50 = vmul.f32 -1.442695, %v214_v18 }
  0xf5   :  { %v239_v22 = vmul.f32 1.442695, %v237_v20  ;;  %v238_v23 = vsub.f32 0.0, %v236_v21 }
  0xf7   :  { %464 = vpow2.f32 %v239_v22  ;;  %v241_v24 = vmul.f32 1.442695, %v238_v23 }
  0xf9   :  { %466 = vpow2.f32 %v241_v24 }
 0x101   :  { %v465_v25 = vpop.eup %464 }
 0x102   :  { %v243_v26 = vadd.f32 1.0, %v465_v25  ;;  %v246_v29 = vmul.f32 -0.5, %v465_v25  ;;  %v249_v32 = vand.u32 2147483647, %v465_v25 }
 0x103   :  { %v467_v27 = vpop.eup %466 }
 0x104   :  { %468 = vlog2.f32 %v243_v26  ;;  %v252_v28 = vadd.f32 1.0, %v467_v27  ;;  %v255_v30 = vmul.f32 -0.5, %v467_v27  ;;  %v247_v31 = vadd.f32 1.0, %v246_v29 }
 0x105   :  { %v258_v35 = vand.u32 2147483647, %v467_v27  ;;  %vm250_vm4 = vcmp.lt.f32.partialorder %v249_v32, 0.0004427343 }
 0x106   :  { %470 = vlog2.f32 %v252_v28  ;;  %v256_v33 = vadd.f32 1.0, %v255_v30  ;;  %v248_v37 = vmul.f32 %v465_v25, %v247_v31 }
 0x107   :  { %vm259_vm5 = vcmp.lt.f32.partialorder %v258_v35, 0.0004427343  ;;  %472 = vpow2.f32 %v415_v49 }
 0x108   :  { %v257_v42 = vmul.f32 %v467_v27, %v256_v33  ;;  %474 = vpow2.f32 %v416_v50 }
 0x10e   :  { %v469_v34 = vpop.eup %468 }
 0x10f   :  { %v245_v36 = vmul.f32 0.6931472, %v469_v34 }
 0x110   :  { %v471_v38 = vpop.eup %470 }
 0x111   :  { %v251_v40 = vsel %vm250_vm4, %v248_v37, %v245_v36  ;;  %v254_v41 = vmul.f32 0.6931472, %v471_v38  ;;  %v473_v51 = vpop.eup %472 }
 0x112   :  { %v261_v43 = vadd.f32 %v251_v40, %v229_v39  ;;  %v475_v52 = vpop.eup %474  ;;  %v223_v54 = vadd.f32 1.0, %v473_v51 }
 0x113   :  { %v260_v45 = vsel %vm259_vm5, %v257_v42, %v254_v41  ;;  %v224_v55 = vadd.f32 1.0, %v475_v52 }
 0x114   :  { %v263_v46 = vsel %vm231_vm6, %v211_v14, %v261_v43  ;;  %v262_v47 = vadd.f32 %v260_v45, %v230_v44  ;;  %476 = vrcp.f32 %v223_v54 }
 0x115   :  { %267 = vrot.lane.b32.xlu1 %v263_v46, %s511_s4  ;;  %478 = vrcp.f32 %v224_v55 }
 0x116   :  { %v264_v48 = vsel %vm232_vm7, %v214_v18, %v262_v47 }
 0x119   :  { %269 = vrot.lane.b32.xlu1 %v264_v48, %s511_s4 }
 0x11e   :  { %v477_v62 = vpop.eup %476 }
 0x11f   :  { %v479_v63 = vpop.eup %478 }
 0x187   :  { %v268_v61 = vpop.permute.xlu1 %267 }
 0x188   :  { %v273_v1 = vmul.f32 %v477_v62, %v268_v61 }
 0x18b   :  { %v270_v0 = vpop.permute.xlu1 %269 }
 0x18c   :  { %v274_v3 = vmul.f32 %v479_v63, %v270_v0 }
 0x18e   :  { %v275_v5 = vpack.c.bf16 %v274_v3, %v273_v1 }
 0x190   :  { %445 = vmatpush3.bf16.msra.mxu1 %v275_v5 }
 0x193   :  { %447 = vmatmul.mubr.msk.bf16.vlgmr.msra.gmra.mrb[0].mxu1 %vm298_vm11, %v296_v6 }
 0x266   :  { %v336_v8 = vpop.f32.mrb[0].mxu1 }
 0x267   :  { %v342_v9 = vadd.f32 %v336_v8, %v297_v7  ;;  %v448_v10 = vpop.f32.mrb[1].mxu1 }
 0x268   :  { %v339_v11 = vpop.f32.mrb[2].mxu1 }
 0x269   :  { %344 = vst.msk [vmem:[#allocation5] sm:$0xff] %vm111_vm0, %v342_v9  ;;  %v449_v12 = vpop.f32.mrb[3].mxu1 }
 0x26a PF:  { %v348_v13 = vld [vmem:[%s653_s6] sm:$0xff]  ;;  %v512_v14 = vmov 0   ;;  %s513_s11 = smov [#allocation5]  }
 0x26b   :  { %v349_v2 = vld [vmem:[%s652_s5] sm:$0xff]  ;;  %480 = vset.pattern.permute.xlu0 %v512_v14  ;;  %s388_s12 = sshll.u32 %s513_s11, 4  ;;  %s389_s12 = int_to_ptr.vmem [resolvable:$true] %s388_s12 }
 0x26c   :  { %v350_v15 = vsub.s32 %v348_v13, %v349_v2  ;;  %v420_v20 = vld [vmem:[%s654_s7] ss:$0 sm:$0xff]  ;;  %s483_s1 = scalar_lea.vmem %s389_s12, 128  ;;  %p488_p6 = scmp.lt.s32.totalorder %s389_s12, %s389_s12 }
 0x26d   :  { %v421_v23 = vld [vmem:[%s655_s8] ss:$0 sm:$0xff]  ;;  %p484_p5 = scmp.ne.s32.totalorder %s389_s12, %s483_s1  ;;  %p489_p7 = scmp.lt.s32.totalorder %s483_s1, %s483_s1 }
 0x26e   :  { %v351_v16 = vcvt.s32.f32 %v350_v15  ;;  %v378_v25 = vld [vmem:[%s656_s9] sm:$0xff] }
 0x26f   :  { %p490_p8 = por %p489_p7, %p488_p6 }
 0x270   :  { %v353_v17 = vmax.f32 %v351_v16, 1.0  ;;  %v352_v19 = vld [vmem:[#allocation5] sm:$0xff] }
 0x271   :  { %p491_p9 = pnand %p490_p8, %p484_p5 }
 0x272   :  { %481 = vrcp.f32 %v353_v17 }
 0x27c   :  { %v482_v18 = vpop.eup %481 }
 0x27d   :  { %358 = vperm.xlu0 %480, %v482_v18  }
 0x2fc   :  { %v359_v21 = vpop.permute.xlu0 %358 }
 0x2fd   :  { %v361_v22 = vmul.f32 %v359_v21, %v352_v19 }
 0x2ff   :  { %v369_v24 = vmul.f32 %v420_v20, %v361_v22 }
 0x301   :  { %v377_v26 = vadd.f32 %v421_v23, %v369_v24 }
 0x303   :  { %v379_v27 = vadd.f32 %v378_v25, %v377_v26 }
 0x305   :  { %381 = vst.msk [vmem:[#allocation5] sm:$0xff] %vm111_vm0, %v379_v27 }
 0x306   :  { %494 = shalt.err (!%p491_p9)
}
 0x307   :  { %s495_s2 = scalar_lea.hbm %s657_s10, 128 }
 0x308   :  { %p496_p10 = scmp.ne.s32.totalorder %s657_s10, %s495_s2  ;;  %p499_p11 = scmp.lt.u32.totalorder %s495_s2, %s657_s10 }
 0x30a   :  { %p501_p12 = pnand %p499_p11, %p496_p10 }
 0x30c   :  { %504 = shalt.err (!%p501_p12)
}
 0x30d   :  { %391 = dma.vmem_to_hbm [thread:$0]  %s389_s12, 128, %s657_s10, [#allocation6]  }
 0x30e   :  { %505 = dma.done.wait [#allocation6], 128  }
 0x30f   :  { %506 = vsyncadd [#allocation6], 4294967168 }
 0x310   :  { %395 = vsyncpa [#allocation6], 1 }

// kernel: _forward_impl.2
= control target key start
LH: loop header
LB: loop body
LE: loop exit
PB: predicated region body
PF: predicated region fallthrough
CT: control target
= control target key end

     0   :  { %vm110_vm0 = vcmask 261120   ;;  %v471_v0 = vmov 0.0   ;;  %s622_s0 = inlined_call_operand.<no memory space> [shape: s32[1], index: 0, kind: input, shape index: {}]   ;;  %s623_s1 = inlined_call_operand.<no memory space> [shape: s32[1], index: 1, kind: input, shape index: {}]   ;;  %s624_s3 = inlined_call_operand.vmem [shape: bf16[72,64], index: 3, kind: input, shape index: {}]   ;;  %s625_s4 = inlined_call_operand.vmem [shape: f32[1,64], index: 4, kind: input, shape index: {}]   ;;  %s626_s5 = inlined_call_operand.vmem [shape: s32[8,1], index: 5, kind: input, shape index: {}]   ;;  %s627_s6 = inlined_call_operand.vmem [shape: s32[8,1], index: 6, kind: input, shape index: {}]   ;;  %s628_s7 = inlined_call_operand.vmem [shape: f32[1,32], index: 7, kind: input, shape index: {}]   ;;  %s629_s8 = inlined_call_operand.vmem [shape: f32[1,32], index: 8, kind: input, shape index: {}]   ;;  %s630_s9 = inlined_call_operand.vmem [shape: f32[8,32], index: 9, kind: input, shape index: {}]   ;;  %s631_s10 = inlined_call_operand.vmem [shape: f32[8,32], index: 10, kind: output, shape index: {}]   ;;  %s632_s2 = inlined_call_operand.vmem [shape: bf16[16,72], index: 2, kind: input, shape index: {}]  }
   0x1   :  { %15 = sst [smem:[#allocation3]] %s622_s0  ;;  %p79_p0 = scmp.gt.s32.totalorder %s623_s1, 1  ;;  %111 = vst.msk [vmem:[%s631_s10] sm:$0xff] %vm110_vm0, %v471_v0 }
   0x2   :  { %p395_p4 = scmp.le.s32.totalorder %s623_s1, 0 }
   0x3   :  { %s80_s21 = scalar_select %p79_p0, %s623_s1, 1 }
   0x4   :  { %v446_v1 = vld [vmem:[%s624_s3] sm:$0xff] (!%p395_p4)   ;;  %v472_v2 = vmov (!%p395_p4), 0.0   ;;  %v447_v3 = vld [vmem:[%s624_s3 + $0x8] sm:$0xff] (!%p395_p4)   ;;  %vm473_vm1 = vmmov (!%p395_p4), 0   ;;  %v448_v4 = vld [vmem:[%s624_s3 + $0x10] sm:$0xff] (!%p395_p4)   ;;  %vm171_vm2 = vcmask (!%p395_p4), 1043456   ;;  %v278_v53 = vlaneseq (!%p395_p4) }
   0x5   :  { %s81_s24 = sadd.s32 %s80_s21, %s622_s0  ;;  %419 = vmatprep.subr.bf16.mxu0 (!%p395_p4), %v472_v2  ;;  %433 = vmatprep.subr.bf16.mxu1 (!%p395_p4), %v472_v2  ;;  %v449_v5 = vld [vmem:[%s624_s3 + $0x18] sm:$0xff] (!%p395_p4)   ;;  %v450_v6 = vld [vmem:[%s624_s3 + $0x20] ss:$0 sps:$4 sm:$0xff] (!%p395_p4)   ;;  %vm167_vm3 = vcmask (!%p395_p4), 588800   ;;  %v474_v10 = vmov (!%p395_p4), 0   ;;  %s275_s29 = sld [smem:[#allocation3]] (!%p395_p4) }
   0x6   :  { %s391_s25 = sadd.s32 4294967295, %s81_s24  ;;  %420 = vmatpush3.bf16.msra.mxu0 (!%p395_p4), %v446_v1  ;;  %429 = vmatprep.mubr.msk.bf16.mxu0 (!%p395_p4), %vm473_vm1, %v472_v2  ;;  %v173_v7 = vsel (!%p395_p4), %vm171_vm2, %v450_v6, 0  ;;  %v282_v9 = vld [vmem:[%s626_s5] sm:$0xff] (!%p395_p4)  ;;  %v279_v57 = vand.u32 (!%p395_p4), 127, %v278_v53  ;;  %vm297_vm11 = vcmask (!%p395_p4), 130048  }
   0x7   :  { %p83_p1 = scmp.lt.s32.totalorder %s391_s25, 0  ;;  %421 = vmatprep.subr.bf16.mxu0 (!%p395_p4), %v472_v2  ;;  %435 = vmatprep.mubr.msk.bf16.mxu1 (!%p395_p4), %vm473_vm1, %v472_v2  ;;  %v287_v11 = vld [vmem:[%s627_s6] sm:$0xff] (!%p395_p4) }
   0x8   :  { %445 = vset.pattern.permute.xlu0 (!%p395_p4), %v474_v10  ;;  %v396_v12 = vld [vmem:[%s625_s4] ss:$0 sm:$0xff] (!%p395_p4)  ;;  %s475_s4 = smov (!%p395_p4), 96  }
   0x9   :  { %s634_s25 = smov (!%p83_p1, %s391_s25), 0  ;;  %284 = vperm.xlu0 (!%p395_p4), %445, %v282_v9  }
   0xa   :  { %p86_p2 = scmp.lt.s32.totalorder %s622_s0, %s634_s25  ;;  %422 = vmatpush3.bf16.msra.mxu0 (!%p395_p4), %v447_v3 }
   0xb   :  { %423 = vmatprep.subr.bf16.mxu0 (!%p395_p4), %v472_v2 }
   0xc   :  { %s636_s0 = smov (!%p86_p2, %s622_s0), %s634_s25  ;;  %116 = sbr.rel (%p395_p4) target bundleno = 616 (0x268), region = 41 }
   0xd   :  { %s392_s30 = sshll.u32 %s636_s0, 1  ;;  %289 = vperm.xlu0 (!%p395_p4), %445, %v287_v11  }
   0xe   :  { %p89_p3 = scmp.lt.s32.totalorder %s392_s30, 1  ;;  %424 = vmatpush3.bf16.msra.mxu0 (!%p395_p4), %v448_v4 }
   0xf   :  { %425 = vmatprep.subr.bf16.mxu0 (!%p395_p4), %v472_v2 }
  0x10   :  { %s638_s30 = smov (!%p89_p3, %s392_s30), 1 }
  0x11   :  { %s393_s11 = sshll.u32 %s638_s30, 2  ;;  %s406_s30 = sshll.u32 (!%p395_p4), %s275_s29, 4 }
  0x12   :  { %s92_s14 = scalar_lea.vmem %s632_s2, %s393_s11  ;;  %426 = vmatpush3.bf16.msra.mxu0 (!%p395_p4), %v449_v5  ;;  %v280_v58 = vstv (!%p395_p4), %s406_s30 }
  0x13   :  { %427 = vmatprep.subr.bf16.mxu0 %v472_v2  ;;  %v451_v8 = vld [vmem:[%s92_s14] sm:$0xff]   ;;  %v281_v59 = vadd.s32 %v280_v58, %v279_v57 }
  0x16   :  { %428 = vmatpush3.bf16.msra.mxu0 %v173_v7  ;;  %v296_v7 = vld [vmem:[%s631_s10] sm:$0xff] }
  0x19   :  { %430 = vmatmul.mubr.msk.bf16.vlgmr.msra.gmra.mrb[0].mxu0 %vm167_vm3, %v451_v8 }
  0x88   :  { %v285_v56 = vpop.permute.xlu0 %284 }
  0x89   :  { %vm286_vm8 = vcmp.ge.s32.totalorder %v281_v59, %v285_v56 }
  0x8c   :  { %v290_v60 = vpop.permute.xlu0 %289 }
  0x8d   :  { %vm291_vm9 = vcmp.lt.s32.totalorder %v281_v59, %v290_v60 }
  0x8e   :  { %vm292_vm10 = vmand %vm286_vm8, %vm291_vm9 }
  0x8f   :  { %v407_v4 = vsel %vm292_vm10, 1.0, %v472_v2 }
  0x90   :  { %v295_v6 = vpack.c.bf16 %v407_v4, %v407_v4 }
  0xec   :  { %v209_v13 = vpop.f32.mrb[0].mxu0 }
  0xed   :  { %v210_v14 = vadd.f32 %v396_v12, %v209_v13  ;;  %v431_v15 = vpop.f32.mrb[1].mxu0 }
  0xee   :  { %v212_v16 = vpop.f32.mrb[2].mxu0 }
  0xef   :  { %v234_v17 = vand.u32 2147483647, %v210_v14  ;;  %v213_v18 = vadd.f32 %v396_v12, %v212_v16  ;;  %v432_v19 = vpop.f32.mrb[3].mxu0  ;;  %v228_v39 = vmax.f32 %v210_v14, 0.0  ;;  %vm230_vm6 = vcmp.ne.f32.partialorder %v210_v14, %v210_v14 }
  0xf0   :  { %v404_v49 = vmul.f32 -1.442695, %v210_v14 }
  0xf1   :  { %v236_v20 = vsub.f32 0.0, %v234_v17  ;;  %v235_v21 = vand.u32 2147483647, %v213_v18  ;;  %v229_v44 = vmax.f32 %v213_v18, 0.0  ;;  %vm231_vm7 = vcmp.ne.f32.partialorder %v213_v18, %v213_v18 }
  0xf2   :  { %v405_v50 = vmul.f32 -1.442695, %v213_v18 }
  0xf3   :  { %v238_v22 = vmul.f32 1.442695, %v236_v20  ;;  %v237_v23 = vsub.f32 0.0, %v235_v21 }
  0xf5   :  { %452 = vpow2.f32 %v238_v22  ;;  %v240_v24 = vmul.f32 1.442695, %v237_v23 }
  0xf7   :  { %454 = vpow2.f32 %v240_v24 }
  0xff   :  { %v453_v25 = vpop.eup %452 }
 0x100   :  { %v242_v26 = vadd.f32 1.0, %v453_v25  ;;  %v245_v29 = vmul.f32 -0.5, %v453_v25  ;;  %v248_v32 = vand.u32 2147483647, %v453_v25 }
 0x101   :  { %v455_v27 = vpop.eup %454 }
 0x102   :  { %456 = vlog2.f32 %v242_v26  ;;  %v251_v28 = vadd.f32 1.0, %v455_v27  ;;  %v254_v30 = vmul.f32 -0.5, %v455_v27  ;;  %v246_v31 = vadd.f32 1.0, %v245_v29 }
 0x103   :  { %v257_v35 = vand.u32 2147483647, %v455_v27  ;;  %vm249_vm4 = vcmp.lt.f32.partialorder %v248_v32, 0.0004427343 }
 0x104   :  { %458 = vlog2.f32 %v251_v28  ;;  %v255_v33 = vadd.f32 1.0, %v254_v30  ;;  %v247_v37 = vmul.f32 %v453_v25, %v246_v31 }
 0x105   :  { %vm258_vm5 = vcmp.lt.f32.partialorder %v257_v35, 0.0004427343  ;;  %460 = vpow2.f32 %v404_v49 }
 0x106   :  { %v256_v42 = vmul.f32 %v455_v27, %v255_v33  ;;  %462 = vpow2.f32 %v405_v50 }
 0x10c   :  { %v457_v34 = vpop.eup %456 }
 0x10d   :  { %v244_v36 = vmul.f32 0.6931472, %v457_v34 }
 0x10e   :  { %v459_v38 = vpop.eup %458 }
 0x10f   :  { %v250_v40 = vsel %vm249_vm4, %v247_v37, %v244_v36  ;;  %v253_v41 = vmul.f32 0.6931472, %v459_v38  ;;  %v461_v51 = vpop.eup %460 }
 0x110   :  { %v260_v43 = vadd.f32 %v250_v40, %v228_v39  ;;  %v463_v52 = vpop.eup %462  ;;  %v222_v54 = vadd.f32 1.0, %v461_v51 }
 0x111   :  { %v259_v45 = vsel %vm258_vm5, %v256_v42, %v253_v41  ;;  %v223_v55 = vadd.f32 1.0, %v463_v52 }
 0x112   :  { %v262_v46 = vsel %vm230_vm6, %v210_v14, %v260_v43  ;;  %v261_v47 = vadd.f32 %v259_v45, %v229_v44  ;;  %464 = vrcp.f32 %v222_v54 }
 0x113   :  { %266 = vrot.lane.b32.xlu1 %v262_v46, %s475_s4  ;;  %466 = vrcp.f32 %v223_v55 }
 0x114   :  { %v263_v48 = vsel %vm231_vm7, %v213_v18, %v261_v47 }
 0x117   :  { %268 = vrot.lane.b32.xlu1 %v263_v48, %s475_s4 }
 0x11c   :  { %v465_v62 = vpop.eup %464 }
 0x11d   :  { %v467_v63 = vpop.eup %466 }
 0x185   :  { %v267_v61 = vpop.permute.xlu1 %266 }
 0x186   :  { %v272_v1 = vmul.f32 %v465_v62, %v267_v61 }
 0x189   :  { %v269_v0 = vpop.permute.xlu1 %268 }
 0x18a   :  { %v273_v3 = vmul.f32 %v467_v63, %v269_v0 }
 0x18c   :  { %v274_v5 = vpack.c.bf16 %v273_v3, %v272_v1 }
 0x18e   :  { %434 = vmatpush3.bf16.msra.mxu1 %v274_v5 }
 0x191   :  { %436 = vmatmul.mubr.msk.bf16.vlgmr.msra.gmra.mrb[0].mxu1 %vm297_vm11, %v295_v6 }
 0x264   :  { %v335_v8 = vpop.f32.mrb[0].mxu1 }
 0x265   :  { %v341_v9 = vadd.f32 %v335_v8, %v296_v7  ;;  %v437_v10 = vpop.f32.mrb[1].mxu1 }
 0x266   :  { %v338_v11 = vpop.f32.mrb[2].mxu1 }
 0x267   :  { %343 = vst.msk [vmem:[%s631_s10] sm:$0xff] %vm110_vm0, %v341_v9  ;;  %v438_v12 = vpop.f32.mrb[3].mxu1 }
 0x268 PF:  { %v347_v2 = vld [vmem:[%s627_s6] sm:$0xff]  ;;  %v476_v14 = vmov 0  }
 0x269   :  { %v348_v13 = vld [vmem:[%s626_s5] sm:$0xff]  ;;  %468 = vset.pattern.permute.xlu0 %v476_v14 }
 0x26a   :  { %v349_v15 = vsub.s32 %v347_v2, %v348_v13  ;;  %v409_v20 = vld [vmem:[%s628_s7] ss:$0 sm:$0xff] }
 0x26b   :  { %v410_v23 = vld [vmem:[%s629_s8] ss:$0 sm:$0xff] }
 0x26c   :  { %v350_v16 = vcvt.s32.f32 %v349_v15  ;;  %v377_v25 = vld [vmem:[%s630_s9] sm:$0xff] }
 0x26e   :  { %v352_v17 = vmax.f32 %v350_v16, 1.0  ;;  %v351_v19 = vld [vmem:[%s631_s10] sm:$0xff] }
 0x270   :  { %469 = vrcp.f32 %v352_v17 }
 0x27a   :  { %v470_v18 = vpop.eup %469 }
 0x27b   :  { %357 = vperm.xlu0 %468, %v470_v18  }
 0x2fa   :  { %v358_v21 = vpop.permute.xlu0 %357 }
 0x2fb   :  { %v360_v22 = vmul.f32 %v358_v21, %v351_v19 }
 0x2fd   :  { %v368_v24 = vmul.f32 %v409_v20, %v360_v22 }
 0x2ff   :  { %v376_v26 = vadd.f32 %v410_v23, %v368_v24 }
 0x301   :  { %v378_v27 = vadd.f32 %v377_v25, %v376_v26 }
 0x303   :  { %380 = vst.msk [vmem:[%s631_s10] sm:$0xff] %vm110_vm0, %v378_v27 }

</bundles_post_ra>
